<compile_context>
chip_gen: v5e
topology: v5e:2x2
jax: 0.10.0
libtpu: 0.0.40
codegen_flags: <defaults>
</compile_context>

<pallas_src>
import functools

import jax
import jax.numpy as jnp
from jax.experimental import pallas as pl
from jax.experimental.pallas import tpu as pltpu

LANE = 128
SUBLANE = 8
NEG_INF = -1e30  # mask value for padded output logits (finite, exp() -> 0)


def _round_up(n, m):
    return ((n + m - 1) // m) * m


# ---------------------------------------------------------------------------
# Kernel: one batch tile through the whole 3-layer MLP + softmax.
# ---------------------------------------------------------------------------
def classifier2_kernel(x_ref, w1_ref, b1_ref, w2_ref, b2_ref, w3_ref, b3_ref,
                       out_ref):
    x = x_ref[...]

    # hidden1 + ReLU  (bf16 x bf16 -> f32 accumulate on the MXU)
    h1 = jnp.dot(x.astype(jnp.bfloat16), w1_ref[...],
                 preferred_element_type=jnp.float32)
    h1 = jnp.maximum(h1 + b1_ref[...], 0.0)

    # hidden2 + ReLU
    h2 = jnp.dot(h1.astype(jnp.bfloat16), w2_ref[...],
                 preferred_element_type=jnp.float32)
    h2 = jnp.maximum(h2 + b2_ref[...], 0.0)

    # output layer; padded lanes get the -1e30 bias -> masked out of softmax
    logits = jnp.dot(h2.astype(jnp.bfloat16), w3_ref[...],
                     preferred_element_type=jnp.float32)
    logits = logits + b3_ref[...]

    # numerically-stable softmax over the last (feature) axis == PyTorch dim=1
    m = jnp.max(logits, axis=-1, keepdims=True)
    e = jnp.exp(logits - m)
    denom = jnp.sum(e, axis=-1, keepdims=True)
    out_ref[...] = (e * pl.reciprocal(denom, approx=True)).astype(out_ref.dtype)


# ---------------------------------------------------------------------------
# Wrapper: batch-tiled pallas_call with resident (constant-block) weights.
# ---------------------------------------------------------------------------
@functools.partial(jax.jit, static_argnames=("out_size", "block_b"))
def classifier2_forward(x, padded_params, *, out_size, block_b=512):
    """x: (B, inputSize) f32.  padded_params: output of prepare_params()."""
    w1, b1, w2, b2, w3, b3 = (padded_params[k]
                              for k in ("w1", "b1", "w2", "b2", "w3", "b3"))
    B, d_in = x.shape
    d_in_p = w1.shape[0]
    d_out_p = w3.shape[1]

    # Batch tile: large to amortize per-grid-step overhead, sublane-aligned.
    tb = _round_up(min(block_b, _round_up(max(B, 1), SUBLANE)), SUBLANE)
    b_pad = _round_up(B, tb)

    # Pad the input to (b_pad, d_in_p); padded rows/cols are zeros.
    if (b_pad, d_in_p) != (B, d_in):
        x_p = jnp.zeros((b_pad, d_in_p), x.dtype).at[:B, :d_in].set(x)
    else:
        x_p = x

    # Weights/biases: constant blocks -> stay VMEM-resident across grid steps.
    const = lambda arr: pl.BlockSpec(arr.shape, lambda i: (0, 0))

    out_padded = pl.pallas_call(
        classifier2_kernel,
        out_shape=jax.ShapeDtypeStruct((b_pad, d_out_p), jnp.float32),
        grid=(b_pad // tb,),
        in_specs=[
            pl.BlockSpec((tb, d_in_p), lambda i: (i, 0)),   # x: batch-tiled
            const(w1), const(b1),
            const(w2), const(b2),
            const(w3), const(b3),
        ],
        out_specs=pl.BlockSpec((tb, d_out_p), lambda i: (i, 0)),
        compiler_params=pltpu.CompilerParams(
            dimension_semantics=("parallel",),  # shard batch tiles across TCs
        ),
    )(x_p, w1, b1, w2, b2, w3, b3)

    # Drop batch padding and the masked output lanes.
    return out_padded[:B, :out_size]


# ---------------------------------------------------------------------------
# Parameter construction (mirrors PyTorch Classifier2 shapes) + TPU padding.
# ---------------------------------------------------------------------------
def init_params(key, input_size, hidden_sizes, output_size):
    """Logical params: transposed weights (in, out) and (1, out) biases, f32."""
    k1, k2, k3, k4, k5, k6 = jax.random.split(key, 6)
    h0, h1 = hidden_sizes

    def lin(kw, kb, fan_in, fan_out):
        scale = 1.0 / jnp.sqrt(jnp.float32(fan_in))
        w = jax.random.uniform(kw, (fan_in, fan_out), jnp.float32, -scale, scale)
        b = jax.random.uniform(kb, (1, fan_out), jnp.float32, -scale, scale)
        return w, b

    w1, b1 = lin(k1, k2, input_size, h0)
    w2, b2 = lin(k3, k4, h0, h1)
    w3, b3 = lin(k5, k6, h1, output_size)
    return dict(w1=w1, b1=b1, w2=w2, b2=b2, w3=w3, b3=b3)


def prepare_params(params, input_size, hidden_sizes, output_size):
    """Pad feature dims to 128 lanes; bf16 weights, f32 biases.

    Zero-padded hidden units stay exactly zero through bias+ReLU, so they do
    not perturb downstream layers.  Padded output lanes get a -1e30 bias so
    the in-kernel softmax assigns them ~0 probability.
    """
    d_in_p = _round_up(input_size, LANE)
    h0_p = _round_up(hidden_sizes[0], LANE)
    h1_p = _round_up(hidden_sizes[1], LANE)
    d_out_p = _round_up(output_size, LANE)

    def pad_w(w, rows, cols):
        return (jnp.zeros((rows, cols), jnp.bfloat16)
                .at[:w.shape[0], :w.shape[1]].set(w.astype(jnp.bfloat16)))

    def pad_b(b, cols, fill=0.0):
        return (jnp.full((1, cols), fill, jnp.float32)
                .at[:, :b.shape[1]].set(b.astype(jnp.float32)))

    return dict(
        w1=pad_w(params["w1"], d_in_p, h0_p), b1=pad_b(params["b1"], h0_p),
        w2=pad_w(params["w2"], h0_p, h1_p),   b2=pad_b(params["b2"], h1_p),
        w3=pad_w(params["w3"], h1_p, d_out_p),
        b3=pad_b(params["b3"], d_out_p, fill=NEG_INF),
    )


if __name__ == "__main__":
    key = jax.random.PRNGKey(0)
    kx, kp = jax.random.split(key)

    batch = 32
    input_size = 32
    hidden_sizes = (64, 32)
    output_size = 16

    x = jax.random.normal(kx, (batch, input_size), jnp.float32)
    params = init_params(kp, input_size, hidden_sizes, output_size)
    padded = prepare_params(params, input_size, hidden_sizes, output_size)

    # Small block_b so the demo exercises multiple grid steps (grid=(2,)).
    out = classifier2_forward(x, padded, out_size=output_size, block_b=16)
    out = jax.block_until_ready(out)

    # Pure-JAX f32 reference of the PyTorch forward pass.
    def reference(x, p):
        h1 = jnp.maximum(x @ p["w1"] + p["b1"], 0.0)
        h2 = jnp.maximum(h1 @ p["w2"] + p["b2"], 0.0)
        return jax.nn.softmax(h2 @ p["w3"] + p["b3"], axis=1)

    expected = reference(x, params)

    assert out.shape == (batch, output_size)
    assert bool(jnp.all(jnp.isfinite(out)))
    # approx reciprocal => slightly relaxed row-sum tolerance
    assert bool(jnp.allclose(jnp.sum(out, axis=1), 1.0, atol=5e-3))
    # bf16 matmul operands => loose match against the f32 reference
    assert bool(jnp.allclose(out, expected, atol=5e-2))

    print("KERNEL_OK")
</pallas_src>

<mosaic_0001>
module attributes {stable_mosaic.version = 11 : i64} {
  func.func @classifier2_kernel(%arg0: i32, %arg1: memref<16x128xf32, #tpu.memory_space<vmem>>, %arg2: memref<128x128xbf16, #tpu.memory_space<vmem>>, %arg3: memref<1x128xf32, #tpu.memory_space<vmem>>, %arg4: memref<128x128xbf16, #tpu.memory_space<vmem>>, %arg5: memref<1x128xf32, #tpu.memory_space<vmem>>, %arg6: memref<128x128xbf16, #tpu.memory_space<vmem>>, %arg7: memref<1x128xf32, #tpu.memory_space<vmem>>, %arg8: memref<16x128xf32, #tpu.memory_space<vmem>>) attributes {dimension_semantics = [#tpu.dimension_semantics<parallel>], iteration_bounds = array<i64: 2>, scalar_prefetch = 0 : i64, scratch_operands = 0 : i64, tpu.core_type = #tpu.core_type<tc>, window_params = [{transform_indices = @transform_0, window_bounds = array<i64: 16, 128>}, {pipeline_mode = #tpu.pipeline_mode<synchronous>, transform_indices = @transform_1, window_bounds = array<i64: 128, 128>}, {pipeline_mode = #tpu.pipeline_mode<synchronous>, transform_indices = @transform_2, window_bounds = array<i64: 1, 128>}, {pipeline_mode = #tpu.pipeline_mode<synchronous>, transform_indices = @transform_3, window_bounds = array<i64: 128, 128>}, {pipeline_mode = #tpu.pipeline_mode<synchronous>, transform_indices = @transform_4, window_bounds = array<i64: 1, 128>}, {pipeline_mode = #tpu.pipeline_mode<synchronous>, transform_indices = @transform_5, window_bounds = array<i64: 128, 128>}, {pipeline_mode = #tpu.pipeline_mode<synchronous>, transform_indices = @transform_6, window_bounds = array<i64: 1, 128>}, {transform_indices = @transform_7, window_bounds = array<i64: 16, 128>}]} {
    %c0 = arith.constant 0 : index
    %c0_0 = arith.constant 0 : index
    %0 = vector.load %arg1[%c0, %c0_0] : memref<16x128xf32, #tpu.memory_space<vmem>>, vector<16x128xf32>
    %1 = arith.truncf %0 : vector<16x128xf32> to vector<16x128xbf16>
    %c0_1 = arith.constant 0 : index
    %c0_2 = arith.constant 0 : index
    %2 = vector.load %arg2[%c0_1, %c0_2] : memref<128x128xbf16, #tpu.memory_space<vmem>>, vector<128x128xbf16>
    %cst = arith.constant dense<0.000000e+00> : vector<16x128xf32>
    %3 = tpu.matmul %1, %2, %cst {dimension_numbers = #tpu.dot_dimension_numbers<[1], [0], [0], [1], [0, 0, 1, 1], [], []>} : vector<16x128xbf16>, vector<128x128xbf16>, vector<16x128xf32> -> vector<16x128xf32>
    %c0_3 = arith.constant 0 : index
    %c0_4 = arith.constant 0 : index
    %4 = vector.load %arg3[%c0_3, %c0_4] : memref<1x128xf32, #tpu.memory_space<vmem>>, vector<1x128xf32>
    %5 = vector.broadcast %4 : vector<1x128xf32> to vector<16x128xf32>
    %6 = arith.addf %3, %5 : vector<16x128xf32>
    %cst_5 = arith.constant 0.000000e+00 : f32
    %7 = vector.broadcast %cst_5 : f32 to vector<16x128xf32>
    %8 = arith.maximumf %6, %7 : vector<16x128xf32>
    %9 = arith.truncf %8 : vector<16x128xf32> to vector<16x128xbf16>
    %c0_6 = arith.constant 0 : index
    %c0_7 = arith.constant 0 : index
    %10 = vector.load %arg4[%c0_6, %c0_7] : memref<128x128xbf16, #tpu.memory_space<vmem>>, vector<128x128xbf16>
    %cst_8 = arith.constant dense<0.000000e+00> : vector<16x128xf32>
    %11 = tpu.matmul %9, %10, %cst_8 {dimension_numbers = #tpu.dot_dimension_numbers<[1], [0], [0], [1], [0, 0, 1, 1], [], []>} : vector<16x128xbf16>, vector<128x128xbf16>, vector<16x128xf32> -> vector<16x128xf32>
    %c0_9 = arith.constant 0 : index
    %c0_10 = arith.constant 0 : index
    %12 = vector.load %arg5[%c0_9, %c0_10] : memref<1x128xf32, #tpu.memory_space<vmem>>, vector<1x128xf32>
    %13 = vector.broadcast %12 : vector<1x128xf32> to vector<16x128xf32>
    %14 = arith.addf %11, %13 : vector<16x128xf32>
    %cst_11 = arith.constant 0.000000e+00 : f32
    %15 = vector.broadcast %cst_11 : f32 to vector<16x128xf32>
    %16 = arith.maximumf %14, %15 : vector<16x128xf32>
    %17 = arith.truncf %16 : vector<16x128xf32> to vector<16x128xbf16>
    %c0_12 = arith.constant 0 : index
    %c0_13 = arith.constant 0 : index
    %18 = vector.load %arg6[%c0_12, %c0_13] : memref<128x128xbf16, #tpu.memory_space<vmem>>, vector<128x128xbf16>
    %cst_14 = arith.constant dense<0.000000e+00> : vector<16x128xf32>
    %19 = tpu.matmul %17, %18, %cst_14 {dimension_numbers = #tpu.dot_dimension_numbers<[1], [0], [0], [1], [0, 0, 1, 1], [], []>} : vector<16x128xbf16>, vector<128x128xbf16>, vector<16x128xf32> -> vector<16x128xf32>
    %c0_15 = arith.constant 0 : index
    %c0_16 = arith.constant 0 : index
    %20 = vector.load %arg7[%c0_15, %c0_16] : memref<1x128xf32, #tpu.memory_space<vmem>>, vector<1x128xf32>
    %21 = vector.broadcast %20 : vector<1x128xf32> to vector<16x128xf32>
    %22 = arith.addf %19, %21 : vector<16x128xf32>
    %cst_17 = arith.constant dense<0xFF800000> : vector<16xf32>
    %23 = vector.multi_reduction <maximumf>, %22, %cst_17 [1] : vector<16x128xf32> to vector<16xf32>
    %24 = vector.shape_cast %23 : vector<16xf32> to vector<16x1xf32>
    %25 = vector.broadcast %24 : vector<16x1xf32> to vector<16x128xf32>
    %26 = arith.subf %22, %25 : vector<16x128xf32>
    %27 = math.exp %26 : vector<16x128xf32>
    %cst_18 = arith.constant dense<0.000000e+00> : vector<16xf32>
    %28 = vector.multi_reduction <add>, %27, %cst_18 [1] : vector<16x128xf32> to vector<16xf32>
    %29 = vector.shape_cast %28 : vector<16xf32> to vector<16x1xf32>
    %30 = tpu.reciprocal %29 {approx = true} : vector<16x1xf32> -> vector<16x1xf32>
    %31 = vector.broadcast %30 : vector<16x1xf32> to vector<16x128xf32>
    %32 = arith.mulf %27, %31 : vector<16x128xf32>
    %c0_19 = arith.constant 0 : index
    %c0_20 = arith.constant 0 : index
    %33 = vector.load %arg8[%c0_19, %c0_20] : memref<16x128xf32, #tpu.memory_space<vmem>>, vector<16x128xf32>
    tpu.vector_store %arg8[%c0_19, %c0_20], %32 {strides = array<i32>} : memref<16x128xf32, #tpu.memory_space<vmem>>, vector<16x128xf32>,
    return
  }
  func.func @transform_0(%arg0: i32) -> (i32, i32) {
    %c0_i32 = arith.constant 0 : i32
    %c0_i32_0 = arith.constant 0 : i32
    return %arg0, %c0_i32 : i32, i32
  }
  func.func @transform_1(%arg0: i32) -> (i32, i32) {
    %c0_i32 = arith.constant 0 : i32
    %c0_i32_0 = arith.constant 0 : i32
    %c0_i32_1 = arith.constant 0 : i32
    return %c0_i32, %c0_i32_0 : i32, i32
  }
  func.func @transform_2(%arg0: i32) -> (i32, i32) {
    %c0_i32 = arith.constant 0 : i32
    %c0_i32_0 = arith.constant 0 : i32
    %c0_i32_1 = arith.constant 0 : i32
    return %c0_i32, %c0_i32_0 : i32, i32
  }
  func.func @transform_3(%arg0: i32) -> (i32, i32) {
    %c0_i32 = arith.constant 0 : i32
    %c0_i32_0 = arith.constant 0 : i32
    %c0_i32_1 = arith.constant 0 : i32
    return %c0_i32, %c0_i32_0 : i32, i32
  }
  func.func @transform_4(%arg0: i32) -> (i32, i32) {
    %c0_i32 = arith.constant 0 : i32
    %c0_i32_0 = arith.constant 0 : i32
    %c0_i32_1 = arith.constant 0 : i32
    return %c0_i32, %c0_i32_0 : i32, i32
  }
  func.func @transform_5(%arg0: i32) -> (i32, i32) {
    %c0_i32 = arith.constant 0 : i32
    %c0_i32_0 = arith.constant 0 : i32
    %c0_i32_1 = arith.constant 0 : i32
    return %c0_i32, %c0_i32_0 : i32, i32
  }
  func.func @transform_6(%arg0: i32) -> (i32, i32) {
    %c0_i32 = arith.constant 0 : i32
    %c0_i32_0 = arith.constant 0 : i32
    %c0_i32_1 = arith.constant 0 : i32
    return %c0_i32, %c0_i32_0 : i32, i32
  }
  func.func @transform_7(%arg0: i32) -> (i32, i32) {
    %c0_i32 = arith.constant 0 : i32
    %c0_i32_0 = arith.constant 0 : i32
    return %arg0, %c0_i32 : i32, i32
  }
}

</mosaic_0001>

<bundles_post_ra>
// kernel: classifier2_forward.1
= control target key start
LH: loop header
LB: loop body
LE: loop exit
PB: predicated region body
PF: predicated region fallthrough
CT: control target
= control target key end

     0   :  { %12 = vsyncpa [#allocation3], 0  ;;  %s892_s24 = smov 0   ;;  %s976_s0 = inlined_call_operand.vmem [shape: f32[32,128], index: 0, kind: input, shape index: {}]   ;;  %s977_s1 = inlined_call_operand.vmem [shape: bf16[128,128], index: 1, kind: input, shape index: {}]   ;;  %s978_s2 = inlined_call_operand.vmem [shape: f32[1,128], index: 2, kind: input, shape index: {}]   ;;  %s979_s3 = inlined_call_operand.vmem [shape: bf16[128,128], index: 3, kind: input, shape index: {}]   ;;  %s980_s4 = inlined_call_operand.vmem [shape: f32[1,128], index: 4, kind: input, shape index: {}]   ;;  %s981_s5 = inlined_call_operand.hbm [shape: bf16[128,128], index: 5, kind: input, shape index: {}]   ;;  %s982_s6 = inlined_call_operand.vmem [shape: f32[1,128], index: 6, kind: input, shape index: {}]   ;;  %s983_s7 = inlined_call_operand.vmem [shape: f32[32,128], index: 7, kind: output, shape index: {}]  }
   0x1 LB: > { %s224_s27 = sshll.u32 %s981_s5, 4  ;;  %s642_s28 = sadd.s32 4294967295, %s847_s24   ;;  %s847_s24 = sphi %s892_s24, %s18_s24   ;;  %s225_s27 = int_to_ptr.hbm [resolvable:$true] %s224_s27 }
   0x2   : > { %p644_p0 = scmp.ge.s32.totalorder %s847_s24, 1  ;;  %p201_p1 = scmp.lt.s32.totalorder %s847_s24, 3 }
   0x3   : > { %p783_p2 = scmp.eq.s32.totalorder %s642_s28, 0  ;;  %s849_s29 = smov [#allocation2]  }
   0x4   : > { %p202_p3 = pnand %p644_p0, %p201_p1  ;;  %s226_s30 = sshll.u32 %s849_s29, 4  ;;  %s227_s30 = int_to_ptr.vmem [resolvable:$true] %s226_s30 }
   0x5   : > { %s850_s8 = smov 64   ;;  %s851_s9 = smov 4  }
   0x6   : > { %p779_p4 = pneg %p202_p3  ;;  %254 = sbr.rel (%p202_p3) target bundleno = 719 (0x2cf), region = 48 }
   0x8   : > { %p780_p5 = pnand %p783_p2, %p779_p4 }
   0xa   : > { %782 = dma.hbm_to_vmem [thread:$0]  (!%p780_p5), %s225_s27, 1024, %s227_s30, [#allocation3], %s850_s8, %s850_s8, %s851_s9  }
   0xb   : > { %842 = dma.done.wait (%p783_p2), [#allocation3], 1024  }
   0xc   : > { %844 = vsyncadd (%p783_p2), [#allocation3], 4294966272  ;;  %v758_v0 = vld [vmem:[%s977_s1 + $0x38] sm:$0xff]  ;;  %v757_v1 = vld [vmem:[%s977_s1 + $0x30] sm:$0xff]  ;;  %s649_s20 = sshll.u32 %s642_s28, 1 }
   0xd   : > { %370 = vmatpush.bf16.msra.mxu0 %v758_v0  ;;  %v766_v2 = vld [vmem:[%s979_s3 + $0x38] sm:$0xff]  ;;  %v765_v3 = vld [vmem:[%s979_s3 + $0x30] sm:$0xff]  ;;  %v756_v4 = vld [vmem:[%s977_s1 + $0x28] sm:$0xff]  ;;  %p288_p6 = scmp.lt.s32.totalorder %s649_s20, 3 }
   0xe   : > { %455 = vmatpush.bf16.msra.mxu1 %v766_v2  ;;  %v764_v5 = vld [vmem:[%s979_s3 + $0x28] sm:$0xff]  ;;  %v755_v6 = vld [vmem:[%s977_s1 + $0x20] sm:$0xff]  ;;  %v754_v8 = vld [vmem:[%s977_s1 + $0x18] sm:$0xff] }
   0xf   : > { %v763_v7 = vld [vmem:[%s979_s3 + $0x20] sm:$0xff]  ;;  %s985_s20 = smov (!%p288_p6, %s649_s20), 3  ;;  %v753_v9 = vld [vmem:[%s977_s1 + $0x10] sm:$0xff]  ;;  %v752_v10 = vld [vmem:[%s977_s1 + $0x8] sm:$0xff] }
  0x10   : > { %s650_s9 = sshll.u32 %s985_s20, 3  ;;  %v751_v11 = vld [vmem:[%s977_s1] sm:$0xff]  ;;  %v762_v15 = vld [vmem:[%s979_s3 + $0x18] sm:$0xff]  ;;  %v761_v16 = vld [vmem:[%s979_s3 + $0x10] sm:$0xff] }
  0x11   : > { %371 = vmatpush.bf16.msra.mxu0 %v757_v1  ;;  %s291_s14 = scalar_lea.vmem %s976_s0, %s650_s9  ;;  %v760_v17 = vld [vmem:[%s979_s3 + $0x8] sm:$0xff]  ;;  %v759_v18 = vld [vmem:[%s979_s3] sm:$0xff]  ;;  %v774_v19 = vld [vmem:[#allocation2 + $0x38] sm:$0xff]  ;;  %s297_s13 = scalar_lea.vmem %s983_s7, %s650_s9 }
  0x12   : > { %456 = vmatpush.bf16.msra.mxu1 %v765_v3  ;;  %v299_v12 = vld [vmem:[%s291_s14] sm:$0xff]  ;;  %v300_v13 = vld [vmem:[%s291_s14 + $0x8] sm:$0xff]  ;;  %540 = vmatpush.bf16.msra.mxu2 %v774_v19  ;;  %v773_v20 = vld [vmem:[#allocation2 + $0x30] sm:$0xff] }
  0x13   : > { %v301_v14 = vpack.c.bf16 %v300_v13, %v299_v12  ;;  %v772_v21 = vld [vmem:[#allocation2 + $0x28] sm:$0xff]  ;;  %v771_v22 = vld [vmem:[#allocation2 + $0x20] sm:$0xff]  ;;  %v770_v31 = vld [vmem:[#allocation2 + $0x18] sm:$0xff] }
  0x14   : > { %v796_v24 = vld [vmem:[%s978_s2] ss:$0 sm:$0xff]  ;;  %v769_v32 = vld [vmem:[#allocation2 + $0x10] sm:$0xff]  ;;  %v768_v33 = vld [vmem:[#allocation2 + $0x8] sm:$0xff] }
  0x15   : > { %372 = vmatpush.bf16.msra.mxu0 %v756_v4  ;;  %v767_v34 = vld [vmem:[#allocation2] sm:$0xff] }
  0x16   : > { %457 = vmatpush.bf16.msra.mxu1 %v764_v5  ;;  %541 = vmatpush.bf16.msra.mxu2 %v773_v20  ;;  %v797_v36 = vld [vmem:[%s980_s4] ss:$0 sm:$0xff] }
  0x17   : > { %v798_v43 = vld [vmem:[%s982_s6] ss:$0 sm:$0xff] }
  0x19   : > { %373 = vmatpush.bf16.msra.mxu0 %v755_v6 }
  0x1a   : > { %458 = vmatpush.bf16.msra.mxu1 %v763_v7  ;;  %542 = vmatpush.bf16.msra.mxu2 %v772_v21 }
  0x1d   : > { %374 = vmatpush.bf16.msra.mxu0 %v754_v8 }
  0x1e   : > { %459 = vmatpush.bf16.msra.mxu1 %v762_v15  ;;  %543 = vmatpush.bf16.msra.mxu2 %v771_v22 }
  0x21   : > { %375 = vmatpush.bf16.msra.mxu0 %v753_v9 }
  0x22   : > { %460 = vmatpush.bf16.msra.mxu1 %v761_v16  ;;  %544 = vmatpush.bf16.msra.mxu2 %v770_v31 }
  0x25   : > { %376 = vmatpush.bf16.msra.mxu0 %v752_v10 }
  0x26   : > { %461 = vmatpush.bf16.msra.mxu1 %v760_v17  ;;  %545 = vmatpush.bf16.msra.mxu2 %v769_v32 }
  0x29   : > { %377 = vmatpush.bf16.msra.mxu0 %v751_v11 }
  0x2a   : > { %462 = vmatpush.bf16.msra.mxu1 %v759_v18  ;;  %546 = vmatpush.bf16.msra.mxu2 %v768_v33 }
  0x2c   : > { %378 = vmatmul.bf16.vlgmr.msra.gmra.mxu0 %v301_v14 }
  0x2e   : > { %547 = vmatpush.bf16.msra.mxu2 %v767_v34 }
  0xa9   : > { %v379_v23 = vpop.f32.mrf.mxu0 }
  0xaa   : > { %v380_v25 = vadd.f32 %v796_v24, %v379_v23 }
  0xac   : > { %v384_v28 = vmax.f32 %v380_v25, 0.0 }
  0xb1   : > { %v381_v26 = vpop.f32.mrf.mxu0 }
  0xb2   : > { %v382_v27 = vadd.f32 %v796_v24, %v381_v26 }
  0xb4   : > { %v385_v29 = vmax.f32 %v382_v27, 0.0 }
  0xb6   : > { %v386_v30 = vpack.c.bf16 %v385_v29, %v384_v28 }
  0xb8   : > { %463 = vmatmul.bf16.vlgmr.msra.gmra.mxu1 %v386_v30 }
 0x135   : > { %v464_v35 = vpop.f32.mrf.mxu1 }
 0x136   : > { %v465_v37 = vadd.f32 %v797_v36, %v464_v35 }
 0x138   : > { %v469_v40 = vmax.f32 %v465_v37, 0.0 }
 0x13d   : > { %v466_v38 = vpop.f32.mrf.mxu1 }
 0x13e   : > { %v467_v39 = vadd.f32 %v797_v36, %v466_v38 }
 0x140   : > { %v470_v41 = vmax.f32 %v467_v39, 0.0 }
 0x142   : > { %v471_v42 = vpack.c.bf16 %v470_v41, %v469_v40 }
 0x144   : > { %548 = vmatmul.bf16.vlgmr.msra.gmra.mxu2 %v471_v42 }
 0x1c7   : > { %v549_v44 = vpop.f32.mrf.mxu2 }
 0x1c8   : > { %v550_v45 = vadd.f32 %v798_v43, %v549_v44 }
 0x1ca   : > { %554 = vmax.xlane.f32.xlu0 %v550_v45 }
 0x1cf   : > { %v551_v46 = vpop.f32.mrf.mxu2 }
 0x1d0   : > { %v552_v47 = vadd.f32 %v798_v43, %v551_v46 }
 0x1d2   : > { %556 = vmax.xlane.f32.xlu0 %v552_v47 }
 0x23d   : > { %v555_v48 = vpop.xlane.xlu0 %554 }
 0x23e   : > { %v558_v49 = vsub.f32 %v550_v45, %v555_v48 }
 0x240   : > { %v560_v50 = vmul.f32 1.442695, %v558_v49 }
 0x242   : > { %799 = vpow2.f32 %v560_v50 }
 0x245   : > { %v557_v51 = vpop.xlane.xlu0 %556 }
 0x246   : > { %v559_v52 = vsub.f32 %v552_v47, %v557_v51 }
 0x248   : > { %v800_v53 = vpop.eup %799  ;;  %v562_v54 = vmul.f32 1.442695, %v559_v52 }
 0x249   : > { %564 = vadd.xlane.f32.xlu1 %v800_v53 }
 0x24a   : > { %801 = vpow2.f32 %v562_v54 }
 0x250   : > { %v802_v55 = vpop.eup %801 }
 0x251   : > { %566 = vadd.xlane.f32.xlu1 %v802_v55 }
 0x2bc   : > { %v565_v56 = vpop.xlane.xlu1 %564 }
 0x2bd   : > { %803 = vrcp.f32 %v565_v56 }
 0x2c3   : > { %v804_v57 = vpop.eup %803 }
 0x2c4   : > { %v570_v58 = vmul.f32 %v804_v57, %v800_v53  ;;  %v567_v59 = vpop.xlane.xlu1 %566 }
 0x2c5   : > { %805 = vrcp.f32 %v567_v59 }
 0x2c6   : > { %572 = vst [vmem:[%s297_s13] sm:$0xff] %v570_v58 }
 0x2cb   : > { %v806_v60 = vpop.eup %805 }
 0x2cc   : > { %v571_v61 = vmul.f32 %v806_v60, %v802_v55 }
 0x2ce   : > { %573 = vst [vmem:[%s297_s13 + $0x8] sm:$0xff] %v571_v61 }
 0x2cf PF: > { %s18_s24 = sadd.s32 1, %s847_s24  }
 0x2d0   : > { %p15_p7 = scmp.ge.s32.totalorder %s18_s24, 4  }
 0x2d2   :  { %17 = sbr.rel (!%p15_p7) target bundleno = 1 (0x1), region = 83 }
 0x2d7   :  { %596 = vsyncpa [#allocation3], 1 }
 0x2d8   :  { %598 = vsyncpa [#allocation3 + $0x1], 1 }

</bundles_post_ra>
